<compile_context>
chip_gen: v7x
topology: tpu7x:2x2x1
jax: 0.10.0
libtpu: 0.0.40
codegen_flags: <defaults>
</compile_context>

<pallas_src>
import jax
import jax.numpy as jnp
from jax.experimental import pallas as pl
from jax.experimental.pallas import tpu as pltpu

IN_DIM = 768
HID_DIM = 256
OUT_DIM = 2


def _round_up(n, m):
    return ((n + m - 1) // m) * m


def _choose_block(B, block_b):
    """Batch tile: multiple of 16 (bf16 sublane pack), <= B, and chosen so the
    grid has >= 2 steps when the batch allows it (v7x megacore sharding)."""
    if B <= 16:
        return B  # single full-batch block (full-dim block is always legal)
    bb = max(16, min(_round_up(block_b, 16), (B // 16) * 16))
    if B >= 32:
        # Guarantee at least two grid steps so both v7x TensorCores get work.
        bb = min(bb, _round_up(pl.cdiv(B, 2), 16))
    return bb


def _mlp_softmax_kernel(x_ref, w1_ref, b1_ref, w2_ref, b2_ref, o_ref):
    # fc1: cast the f32 tile to bf16 in-kernel (no extra HBM pass), bf16 MXU
    # matmul with f32 accumulation.
    x_bf = x_ref[...].astype(jnp.bfloat16)
    h = jnp.dot(x_bf, w1_ref[...], preferred_element_type=jnp.float32)
    h = jnp.tanh(h + b1_ref[...])
    # fc2 (tiny N=2 matmul) in f32.
    logits = jnp.dot(h, w2_ref[...], preferred_element_type=jnp.float32)
    logits = logits + b2_ref[...]
    # Numerically stable softmax over the class axis; exact division so each
    # row sums to 1 to f32 precision.
    m = jnp.max(logits, axis=-1, keepdims=True)
    e = jnp.exp(logits - m)
    denom = jnp.sum(e, axis=-1, keepdims=True)
    o_ref[...] = (e / denom).astype(o_ref.dtype)


def sentiment_forward(x, w1, b1, w2, b2, *, block_b=1024):
    """softmax(tanh(x @ w1 + b1) @ w2 + b2). x: (B, 768); returns (B, 2) f32."""
    B, D = x.shape
    assert D == IN_DIM
    bb = _choose_block(B, block_b)
    grid = (pl.cdiv(B, bb),)

    # Stream x as f32 (cast to bf16 happens inside the kernel). Pre-convert
    # W1 to bf16 once outside this call for repeated use; we only cast here
    # if the caller didn't.
    x_f = x if x.dtype == jnp.float32 else x.astype(jnp.float32)
    w1_bf = w1 if w1.dtype == jnp.bfloat16 else w1.astype(jnp.bfloat16)
    w2_f = w2.astype(jnp.float32)
    b1_2d = b1.reshape(1, HID_DIM).astype(jnp.float32)
    b2_2d = b2.reshape(1, OUT_DIM).astype(jnp.float32)

    return pl.pallas_call(
        _mlp_softmax_kernel,
        out_shape=jax.ShapeDtypeStruct((B, OUT_DIM), jnp.float32),
        grid_spec=pltpu.PrefetchScalarGridSpec(
            num_scalar_prefetch=0,
            grid=grid,
            in_specs=[
                pl.BlockSpec((bb, IN_DIM), lambda i: (i, 0)),        # x tile (f32)
                pl.BlockSpec((IN_DIM, HID_DIM), lambda i: (0, 0)),   # W1 (bf16, resident)
                pl.BlockSpec((1, HID_DIM), lambda i: (0, 0)),        # b1
                pl.BlockSpec((HID_DIM, OUT_DIM), lambda i: (0, 0)),  # W2 (f32)
                pl.BlockSpec((1, OUT_DIM), lambda i: (0, 0)),        # b2
            ],
            out_specs=pl.BlockSpec((bb, OUT_DIM), lambda i: (i, 0)),
        ),
        compiler_params=pltpu.CompilerParams(
            # Batch axis is embarrassingly parallel -> megacore sharding on v7x.
            dimension_semantics=("parallel",),
        ),
    )(x_f, w1_bf, b1_2d, w2_f, b2_2d)


def init_params(key):
    k1, k2, k3, k4 = jax.random.split(key, 4)
    # PyTorch-Linear-like uniform init (bound = 1/sqrt(fan_in)), deterministic.
    bound1 = 1.0 / (IN_DIM ** 0.5)
    bound2 = 1.0 / (HID_DIM ** 0.5)
    w1 = jax.random.uniform(k1, (IN_DIM, HID_DIM), jnp.float32, -bound1, bound1)
    b1 = jax.random.uniform(k2, (HID_DIM,), jnp.float32, -bound1, bound1)
    w2 = jax.random.uniform(k3, (HID_DIM, OUT_DIM), jnp.float32, -bound2, bound2)
    b2 = jax.random.uniform(k4, (OUT_DIM,), jnp.float32, -bound2, bound2)
    return w1, b1, w2, b2


# TODO(synk): Model.predict (host-side python argmax loop) is inference glue,
# not part of the forward pass; use jnp.argmax(out, axis=-1) outside the kernel.


if __name__ == "__main__":
    key = jax.random.PRNGKey(0)
    kx, kp = jax.random.split(key)

    # Small demo batch, deliberately NOT a multiple of 16 so the ragged edge
    # (masked) block path is exercised: bb=16, grid=(2,).
    B = 20
    x = jax.random.normal(kx, (B, IN_DIM), jnp.float32)
    w1, b1, w2, b2 = init_params(kp)

    # Pre-convert the large weight once (per perf review).
    w1_bf = w1.astype(jnp.bfloat16)

    out = sentiment_forward(x, w1_bf, b1, w2, b2)
    out = jax.block_until_ready(out)

    # Sanity: shape and softmax rows summing to 1 (exact division -> tight tol).
    assert out.shape == (B, OUT_DIM)
    assert jnp.allclose(jnp.sum(out, axis=-1), 1.0, atol=1e-4)

    # Cross-check against a plain-JAX f32 reference. Tolerance loosened since
    # x / W1 go through bf16 on the MXU (accumulation is f32).
    ref_h = jnp.tanh(x @ w1 + b1)
    ref = jax.nn.softmax(ref_h @ w2 + b2, axis=-1)
    assert jnp.allclose(out, ref, atol=2e-2)

    print("KERNEL_OK")
</pallas_src>

<mosaic_0001>
module attributes {stable_mosaic.version = 11 : i64} {
  func.func @_mlp_softmax_kernel(%arg0: i32, %arg1: memref<16x768xf32, #tpu.memory_space<vmem>>, %arg2: memref<768x256xbf16, #tpu.memory_space<vmem>>, %arg3: memref<1x256xf32, #tpu.memory_space<vmem>>, %arg4: memref<256x2xf32, #tpu.memory_space<vmem>>, %arg5: memref<1x2xf32, #tpu.memory_space<vmem>>, %arg6: memref<16x2xf32, #tpu.memory_space<vmem>>) attributes {dimension_semantics = [#tpu.dimension_semantics<parallel>], iteration_bounds = array<i64: 2>, scalar_prefetch = 0 : i64, scratch_operands = 0 : i64, tpu.core_type = #tpu.core_type<tc>, window_params = [{transform_indices = @transform_0, window_bounds = array<i64: 16, 768>}, {pipeline_mode = #tpu.pipeline_mode<synchronous>, transform_indices = @transform_1, window_bounds = array<i64: 768, 256>}, {pipeline_mode = #tpu.pipeline_mode<synchronous>, transform_indices = @transform_2, window_bounds = array<i64: 1, 256>}, {pipeline_mode = #tpu.pipeline_mode<synchronous>, transform_indices = @transform_3, window_bounds = array<i64: 256, 2>}, {pipeline_mode = #tpu.pipeline_mode<synchronous>, transform_indices = @transform_4, window_bounds = array<i64: 1, 2>}, {transform_indices = @transform_5, window_bounds = array<i64: 16, 2>}]} {
    %c0 = arith.constant 0 : index
    %c0_0 = arith.constant 0 : index
    %0 = vector.load %arg1[%c0, %c0_0] : memref<16x768xf32, #tpu.memory_space<vmem>>, vector<16x768xf32>
    %1 = arith.truncf %0 : vector<16x768xf32> to vector<16x768xbf16>
    %c0_1 = arith.constant 0 : index
    %c0_2 = arith.constant 0 : index
    %2 = vector.load %arg2[%c0_1, %c0_2] : memref<768x256xbf16, #tpu.memory_space<vmem>>, vector<768x256xbf16>
    %cst = arith.constant dense<0.000000e+00> : vector<16x256xf32>
    %3 = tpu.matmul %1, %2, %cst {dimension_numbers = #tpu.dot_dimension_numbers<[1], [0], [0], [1], [0, 0, 1, 1], [], []>} : vector<16x768xbf16>, vector<768x256xbf16>, vector<16x256xf32> -> vector<16x256xf32>
    %c0_3 = arith.constant 0 : index
    %c0_4 = arith.constant 0 : index
    %4 = vector.load %arg3[%c0_3, %c0_4] : memref<1x256xf32, #tpu.memory_space<vmem>>, vector<1x256xf32>
    %5 = vector.broadcast %4 : vector<1x256xf32> to vector<16x256xf32>
    %6 = arith.addf %3, %5 : vector<16x256xf32>
    %7 = math.tanh %6 : vector<16x256xf32>
    %c0_5 = arith.constant 0 : index
    %c0_6 = arith.constant 0 : index
    %8 = vector.load %arg4[%c0_5, %c0_6] : memref<256x2xf32, #tpu.memory_space<vmem>>, vector<256x2xf32>
    %cst_7 = arith.constant dense<0.000000e+00> : vector<16x2xf32>
    %9 = tpu.matmul %7, %8, %cst_7 {dimension_numbers = #tpu.dot_dimension_numbers<[1], [0], [0], [1], [0, 0, 1, 1], [], []>} : vector<16x256xf32>, vector<256x2xf32>, vector<16x2xf32> -> vector<16x2xf32>
    %c0_8 = arith.constant 0 : index
    %c0_9 = arith.constant 0 : index
    %10 = vector.load %arg5[%c0_8, %c0_9] : memref<1x2xf32, #tpu.memory_space<vmem>>, vector<1x2xf32>
    %11 = vector.broadcast %10 : vector<1x2xf32> to vector<16x2xf32>
    %12 = arith.addf %9, %11 : vector<16x2xf32>
    %cst_10 = arith.constant dense<0xFF800000> : vector<16xf32>
    %13 = vector.multi_reduction <maximumf>, %12, %cst_10 [1] : vector<16x2xf32> to vector<16xf32>
    %14 = vector.shape_cast %13 : vector<16xf32> to vector<16x1xf32>
    %15 = vector.broadcast %14 : vector<16x1xf32> to vector<16x2xf32>
    %16 = arith.subf %12, %15 : vector<16x2xf32>
    %17 = math.exp %16 : vector<16x2xf32>
    %cst_11 = arith.constant dense<0.000000e+00> : vector<16xf32>
    %18 = vector.multi_reduction <add>, %17, %cst_11 [1] : vector<16x2xf32> to vector<16xf32>
    %19 = vector.shape_cast %18 : vector<16xf32> to vector<16x1xf32>
    %20 = vector.broadcast %19 : vector<16x1xf32> to vector<16x2xf32>
    %21 = arith.divf %17, %20 : vector<16x2xf32>
    %c0_12 = arith.constant 0 : index
    %c0_13 = arith.constant 0 : index
    %22 = vector.load %arg6[%c0_12, %c0_13] : memref<16x2xf32, #tpu.memory_space<vmem>>, vector<16x2xf32>
    tpu.vector_store %arg6[%c0_12, %c0_13], %21 {strides = array<i32>} : memref<16x2xf32, #tpu.memory_space<vmem>>, vector<16x2xf32>,
    return
  }
  func.func @transform_0(%arg0: i32) -> (i32, i32) {
    %c0_i32 = arith.constant 0 : i32
    %c0_i32_0 = arith.constant 0 : i32
    return %arg0, %c0_i32 : i32, i32
  }
  func.func @transform_1(%arg0: i32) -> (i32, i32) {
    %c0_i32 = arith.constant 0 : i32
    %c0_i32_0 = arith.constant 0 : i32
    %c0_i32_1 = arith.constant 0 : i32
    return %c0_i32, %c0_i32_0 : i32, i32
  }
  func.func @transform_2(%arg0: i32) -> (i32, i32) {
    %c0_i32 = arith.constant 0 : i32
    %c0_i32_0 = arith.constant 0 : i32
    %c0_i32_1 = arith.constant 0 : i32
    return %c0_i32, %c0_i32_0 : i32, i32
  }
  func.func @transform_3(%arg0: i32) -> (i32, i32) {
    %c0_i32 = arith.constant 0 : i32
    %c0_i32_0 = arith.constant 0 : i32
    %c0_i32_1 = arith.constant 0 : i32
    return %c0_i32, %c0_i32_0 : i32, i32
  }
  func.func @transform_4(%arg0: i32) -> (i32, i32) {
    %c0_i32 = arith.constant 0 : i32
    %c0_i32_0 = arith.constant 0 : i32
    %c0_i32_1 = arith.constant 0 : i32
    return %c0_i32, %c0_i32_0 : i32, i32
  }
  func.func @transform_5(%arg0: i32) -> (i32, i32) {
    %c0_i32 = arith.constant 0 : i32
    %c0_i32_0 = arith.constant 0 : i32
    return %arg0, %c0_i32 : i32, i32
  }
}

</mosaic_0001>

<bundles_post_ra>
// kernel: tpu_custom_call.1
= control target key start
LH: loop header
LB: loop body
LE: loop exit
PB: predicated region body
PF: predicated region fallthrough
CT: control target
= control target key end

     0   :  { %10 = vsyncpa [#allocation3], 0  ;;  %s2001_s18 = smov 0   ;;  %s2003_s19 = smov 0   ;;  %s2241_s0 = inlined_call_operand.vmem [shape: f32[20,768], index: 0, kind: input, shape index: {}]   ;;  %s2242_s1 = inlined_call_operand.hbm [shape: bf16[768,256], index: 1, kind: input, shape index: {}]   ;;  %s2243_s2 = inlined_call_operand.vmem [shape: f32[1,256], index: 2, kind: input, shape index: {}]   ;;  %s2244_s3 = inlined_call_operand.vmem [shape: f32[256,2], index: 3, kind: input, shape index: {}]   ;;  %s2245_s4 = inlined_call_operand.vmem [shape: f32[1,2], index: 4, kind: input, shape index: {}]   ;;  %s2246_s5 = inlined_call_operand.vmem [shape: f32[20,2], index: 5, kind: output, shape index: {}]  }
   0x1   :  { %s2005_s20 = smov 0  }
   0x2 LB: > { %s2014_s21 = sadd.s32 4294967295, %s1934_s20   ;;  %s2016_s22 = sadd.s32 1, %s1934_s20   ;;  %s1934_s20 = sphi %s2005_s20, %s2258_s20   ;;  %s1930_s19 = sphi %s2003_s19, %s2257_s19   ;;  %s1926_s18 = sphi %s2001_s18, %s2256_s18  }
   0x3   : > { %s130_s23 = ssub.s32 %s1934_s20, %s2016_s22  ;;  %s133_s24 = sadd.s32 1, %s1930_s19 }
   0x4   : > { %p131_p0 = scmp.eq.s32.totalorder %s130_s23, 0  ;;  %p143_p1 = scmp.ne.s32.totalorder %s1930_s19, %s1926_s18 }
   0x5   : > { %p144_p2 = scmp.eq.s32.totalorder %s2014_s21, 1  ;;  %p1379_p3 = scmp.ge.s32.totalorder %s1934_s20, 1 }
   0x6   : > { %s2024_s25 = scalar_select %p131_p0, %s1930_s19, %s133_s24  }
   0x7   : > { %p2026_p4 = por %p144_p2, %p143_p1  ;;  %p157_p5 = scmp.lt.s32.totalorder %s1934_s20, 3 }
   0x8   : > { %p2247_p6 = scmp.eq.s32.totalorder %s2014_s21, 0  ;;  %s1968_s28 = smov [#allocation2]  }
   0x9   : > { %s2249_s26 = scalar_select %p2026_p4, 1, 0 }
   0xa   : > { %p2031_p7 = pnand %p1379_p3, %p157_p5  ;;  %s169_s29 = sshll.u32 %s1968_s28, 4  ;;  %s170_s29 = int_to_ptr.vmem [resolvable:$true] %s169_s29 }
   0xb   : > { %s1848_s8 = scalar_lea.hbm %s2242_s1, 12288 }
   0xc   : > { %s2250_s27 = scalar_select %p2031_p7, 1, 0 }
   0xd   : > { %p1591_p8 = pneg %p2031_p7  ;;  %p1849_p10 = scmp.ne.s32.totalorder %s2242_s1, %s1848_s8 }
   0xe   : > { %p1855_p0 = scmp.lt.u32.totalorder %s1848_s8, %s2242_s1 }
   0xf   : > { %p2039_p9 = pnand %p2247_p6, %p1591_p8 }
  0x11   : > { %p1850_p11 = pneg %p2039_p9 }
  0x13   : > { %p1851_p12 = pnand %p1850_p11, %p1849_p10 }
  0x15   : > { %p1852_p13 = pneg %p1851_p12 }
  0x17   : > { %p1857_p1 = pnand %p1855_p0, %p1852_p13 }
  0x19   : > { %1860 = shalt.err (!%p1857_p1)
}
  0x1a   : > { %s1861_s13 = scalar_lea.vmem %s170_s29, 12288  ;;  %p1869_p8 = scmp.lt.s32.totalorder %s170_s29, %s170_s29 }
  0x1b   : > { %p1862_p2 = scmp.ne.s32.totalorder %s170_s29, %s1861_s13  ;;  %p1870_p6 = scmp.lt.s32.totalorder %s1861_s13, %s1861_s13 }
  0x1d   : > { %p1864_p3 = pnand %p1862_p2, %p1850_p11  ;;  %p1871_p4 = por %p1870_p6, %p1869_p8 }
  0x1f   : > { %p1865_p5 = pneg %p1864_p3 }
  0x21   : > { %p1872_p7 = pnand %p1871_p4, %p1865_p5 }
  0x23   : > { %1875 = shalt.err (!%p1872_p7)
}
  0x24   : > { %s1969_s14 = smov 128   ;;  %s1970_s15 = smov 8  }
  0x25   : > { %1594 = dma.hbm_to_vmem [thread:$0]  (!%p2039_p9), %s2242_s1, 12288, %s170_s29, [#allocation3], %s1969_s14, %s1969_s14, %s1970_s15  }
  0x26   : > { %p2252_p10 = scmp.ne.s32.totalorder %s2250_s27, 0 }
  0x27   : > { %p2253_p12 = scmp.eq.s32.totalorder (!%p2252_p10), %s2014_s21, 0 }
  0x28   : > { %214 = sbr.rel (%p2252_p10) target bundleno = 989 (0x3dd), region = 40 }
  0x2f   : > { %1921 = dma.done.wait (%p2253_p12), [#allocation3], 12288   ;;  %p2254_p11 = pmov %p2253_p12 }
  0x30   : > { %v1688_v0 = vld [vmem:[#allocation2 + $0x104] ss:$8 sps:$4 sm:$0xff]   ;;  %v1690_v1 = vld [vmem:[#allocation2 + $0x100] ss:$8 sps:$4 sm:$0xff]   ;;  %v1691_v2 = vld [vmem:[#allocation2 + $0x114] ss:$8 sps:$4 sm:$0xff]  }
  0x31   : > { %1923 = vsyncadd (%p2254_p11), [#allocation3], 4294955008  ;;  %918 = vmatprep.subr.bf16.mxu0 %v1688_v0  ;;  %v1693_v3 = vld [vmem:[#allocation2 + $0x110] ss:$8 sps:$4 sm:$0xff]   ;;  %v1694_v4 = vld [vmem:[#allocation2 + $0x124] ss:$8 sps:$4 sm:$0xff]  }
  0x32   : > { %919 = vmatpush1.bf16.msra.mxu0 %v1690_v1  ;;  %s2066_s20 = sshll.u32 %s2014_s21, 1  ;;  %v1696_v5 = vld [vmem:[#allocation2 + $0x120] ss:$8 sps:$4 sm:$0xff]   ;;  %v1697_v6 = vld [vmem:[#allocation2 + $0x134] ss:$8 sps:$4 sm:$0xff]   ;;  %vm1122_vm0 = vcmask 15360  }
  0x33   : > { %920 = vmatprep.subr.bf16.mxu0 %v1691_v2  ;;  %p253_p4 = scmp.lt.s32.totalorder %s2066_s20, 2  ;;  %v1699_v7 = vld [vmem:[#allocation2 + $0x130] ss:$8 sps:$4 sm:$0xff]   ;;  %v1700_v8 = vld [vmem:[#allocation2 + $0x144] ss:$8 sps:$4 sm:$0xff]   ;;  %p2255_p6 = scmp.ne.s32.totalorder %s2249_s26, 0 }
  0x34   : > { %v1702_v9 = vld [vmem:[#allocation2 + $0x140] ss:$8 sps:$4 sm:$0xff]   ;;  %v1703_v10 = vld [vmem:[#allocation2 + $0x154] ss:$8 sps:$4 sm:$0xff]   ;;  %v1705_v11 = vld [vmem:[#allocation2 + $0x150] ss:$8 sps:$4 sm:$0xff]  }
  0x35   : > { %s254_s23 = scalar_select %p253_p4, %s2066_s20, 2  ;;  %v1706_v12 = vld [vmem:[#allocation2 + $0x164] ss:$8 sps:$4 sm:$0xff]   ;;  %v1735_v14 = vld [vmem:[#allocation2] ss:$8 sps:$4 sm:$0xff]  }
  0x36   : > { %921 = vmatpush1.bf16.msra.mxu0 %v1693_v3  ;;  %v1733_v13 = vld [vmem:[#allocation2 + $0x4] ss:$8 sps:$4 sm:$0xff]   ;;  %v1708_v15 = vld [vmem:[#allocation2 + $0x160] ss:$8 sps:$4 sm:$0xff]   ;;  %v1709_v16 = vld [vmem:[#allocation2 + $0x174] ss:$8 sps:$4 sm:$0xff]  }
  0x37   : > { %922 = vmatprep.subr.bf16.mxu0 %v1694_v4  ;;  %s1586_s24 = smul.u32 48, %s254_s23  ;;  %875 = vmatprep.subr.bf16.mxu1 %v1733_v13  ;;  %v1739_v17 = vld [vmem:[#allocation2 + $0x14] ss:$8 sps:$4 sm:$0xff]   ;;  %v1741_v18 = vld [vmem:[#allocation2 + $0x10] ss:$8 sps:$4 sm:$0xff]   ;;  %s1501_s30 = sshll.u32 (%p2255_p6), %s2014_s21, 4 }
  0x38   : > { %876 = vmatpush1.bf16.msra.mxu1 %v1735_v14  ;;  %v1711_v22 = vld [vmem:[#allocation2 + $0x170] ss:$8 sps:$4 sm:$0xff]   ;;  %v1745_v23 = vld [vmem:[#allocation2 + $0x24] ss:$8 sps:$4 sm:$0xff]   ;;  %v1747_v24 = vld [vmem:[#allocation2 + $0x20] ss:$8 sps:$4 sm:$0xff]   ;;  %s2207_s8 = scalar_lea.vmem (%p2255_p6), %s2246_s5, %s1501_s30  }
  0x39   : > { %s2073_s29 = scalar_lea.vmem %s2241_s0, %s1586_s24  ;;  %877 = vmatprep.subr.bf16.mxu1 %v1739_v17  ;;  %v1712_v25 = vld [vmem:[#allocation2 + $0x184] ss:$8 sps:$4 sm:$0xff]   ;;  %v1714_v26 = vld [vmem:[#allocation2 + $0x180] ss:$8 sps:$4 sm:$0xff]   ;;  %v1751_v27 = vld [vmem:[#allocation2 + $0x34] ss:$8 sps:$4 sm:$0xff]  }
  0x3a   : > { %923 = vmatpush1.bf16.msra.mxu0 %v1696_v5  ;;  %v272_v19 = vld [vmem:[%s2073_s29 + $0x18] sm:$0xff]  ;;  %v278_v20 = vld [vmem:[%s2073_s29 + $0x48] sm:$0xff]  ;;  %v271_v57 = vld [vmem:[%s2073_s29 + $0x10] sm:$0xff] }
  0x3b   : > { %924 = vmatprep.subr.bf16.mxu0 %v1697_v6  ;;  %v284_v21 = vpack.c.bf16 %v278_v20, %v272_v19  ;;  %v1715_v28 = vld [vmem:[#allocation2 + $0x194] ss:$8 sps:$4 sm:$0xff]   ;;  %v1753_v29 = vld [vmem:[#allocation2 + $0x30] ss:$8 sps:$4 sm:$0xff]   ;;  %v1757_v30 = vld [vmem:[#allocation2 + $0x44] ss:$8 sps:$4 sm:$0xff]  }
  0x3c   : > { %878 = vmatpush1.bf16.msra.mxu1 %v1741_v18  ;;  %v1717_v31 = vld [vmem:[#allocation2 + $0x190] ss:$8 sps:$4 sm:$0xff]   ;;  %v1718_v32 = vld [vmem:[#allocation2 + $0x1a4] ss:$8 sps:$4 sm:$0xff]   ;;  %v1759_v33 = vld [vmem:[#allocation2 + $0x40] ss:$8 sps:$4 sm:$0xff]  }
  0x3d   : > { %950 = vmatprep.mubr.bf16.mxu0 %v284_v21  ;;  %879 = vmatprep.subr.bf16.mxu1 %v1745_v23  ;;  %v1763_v34 = vld [vmem:[#allocation2 + $0x54] ss:$8 sps:$4 sm:$0xff]   ;;  %v1720_v35 = vld [vmem:[#allocation2 + $0x1a0] ss:$8 sps:$4 sm:$0xff]   ;;  %v1765_v37 = vld [vmem:[#allocation2 + $0x50] ss:$8 sps:$4 sm:$0xff]  }
  0x3e   : > { %925 = vmatpush1.bf16.msra.mxu0 %v1699_v7  ;;  %v1721_v36 = vld [vmem:[#allocation2 + $0x1b4] ss:$8 sps:$4 sm:$0xff]   ;;  %v1769_v38 = vld [vmem:[#allocation2 + $0x64] ss:$8 sps:$4 sm:$0xff]   ;;  %v1723_v39 = vld [vmem:[#allocation2 + $0x1b0] ss:$8 sps:$4 sm:$0xff]  }
  0x3f   : > { %926 = vmatprep.subr.bf16.mxu0 %v1700_v8  ;;  %v1724_v40 = vld [vmem:[#allocation2 + $0x1c4] ss:$8 sps:$4 sm:$0xff]   ;;  %v1771_v41 = vld [vmem:[#allocation2 + $0x60] ss:$8 sps:$4 sm:$0xff]   ;;  %v1775_v42 = vld [vmem:[#allocation2 + $0x74] ss:$8 sps:$4 sm:$0xff]  }
  0x40   : > { %880 = vmatpush1.bf16.msra.mxu1 %v1747_v24  ;;  %v1726_v43 = vld [vmem:[#allocation2 + $0x1c0] ss:$8 sps:$4 sm:$0xff]   ;;  %v1727_v44 = vld [vmem:[#allocation2 + $0x1d4] ss:$8 sps:$4 sm:$0xff]   ;;  %v1777_v45 = vld [vmem:[#allocation2 + $0x70] ss:$8 sps:$4 sm:$0xff]  }
  0x41   : > { %881 = vmatprep.subr.bf16.mxu1 %v1751_v27  ;;  %v1781_v46 = vld [vmem:[#allocation2 + $0x84] ss:$8 sps:$4 sm:$0xff]   ;;  %v1729_v47 = vld [vmem:[#allocation2 + $0x1d0] ss:$8 sps:$4 sm:$0xff]   ;;  %v1783_v49 = vld [vmem:[#allocation2 + $0x80] ss:$8 sps:$4 sm:$0xff]  }
  0x42   : > { %927 = vmatpush1.bf16.msra.mxu0 %v1702_v9  ;;  %v1730_v48 = vld [vmem:[#allocation2 + $0x1e4] ss:$8 sps:$4 sm:$0xff]   ;;  %v1787_v50 = vld [vmem:[#allocation2 + $0x94] ss:$8 sps:$4 sm:$0xff]   ;;  %v1732_v51 = vld [vmem:[#allocation2 + $0x1e0] ss:$8 sps:$4 sm:$0xff]  }
  0x43   : > { %928 = vmatprep.subr.bf16.mxu0 %v1703_v10  ;;  %v1736_v52 = vld [vmem:[#allocation2 + $0x1f4] ss:$8 sps:$4 sm:$0xff]   ;;  %v1789_v53 = vld [vmem:[#allocation2 + $0x90] ss:$8 sps:$4 sm:$0xff]   ;;  %v1793_v54 = vld [vmem:[#allocation2 + $0xa4] ss:$8 sps:$4 sm:$0xff]  }
  0x44   : > { %882 = vmatpush1.bf16.msra.mxu1 %v1753_v29  ;;  %v1738_v55 = vld [vmem:[#allocation2 + $0x1f0] ss:$8 sps:$4 sm:$0xff]   ;;  %v1744_v56 = vld [vmem:[#allocation2 + $0x204] ss:$8 sps:$4 sm:$0xff]   ;;  %v1795_v59 = vld [vmem:[#allocation2 + $0xa0] ss:$8 sps:$4 sm:$0xff]  }
  0x45   : > { %883 = vmatprep.subr.bf16.mxu1 %v1757_v30  ;;  %v277_v58 = vld [vmem:[%s2073_s29 + $0x40] sm:$0xff]  ;;  %v1799_v60 = vld [vmem:[#allocation2 + $0xb4] ss:$8 sps:$4 sm:$0xff]   ;;  %v1801_v0 = vld [vmem:[#allocation2 + $0xb0] ss:$8 sps:$4 sm:$0xff]  }
  0x46   : > { %929 = vmatpush1.bf16.msra.mxu0 %v1705_v11  ;;  %v1742_v61 = vld [vmem:[#allocation2 + $0x200] ss:$8 sps:$4 sm:$0xff]   ;;  %v283_v62 = vpack.c.bf16 %v277_v58, %v271_v57  ;;  %v1750_v63 = vld [vmem:[#allocation2 + $0x214] ss:$8 sps:$4 sm:$0xff]   ;;  %v1805_v1 = vld [vmem:[#allocation2 + $0xc4] ss:$8 sps:$4 sm:$0xff]  }
  0x47   : > { %930 = vmatprep.subr.bf16.mxu0 %v1706_v12  ;;  %v270_v2 = vld [vmem:[%s2073_s29 + $0x8] sm:$0xff]  ;;  %v276_v3 = vld [vmem:[%s2073_s29 + $0x38] sm:$0xff]  ;;  %v1024_v20 = vld [vmem:[%s2244_s3 + $0x80] sm:$0xff] }
  0x48   : > { %884 = vmatpush1.bf16.msra.mxu1 %v1759_v33  ;;  %v282_v4 = vpack.c.bf16 %v276_v3, %v270_v2  ;;  %v274_v5 = vld [vmem:[%s2073_s29 + $0x28] sm:$0xff]  ;;  %v1748_v6 = vld [vmem:[#allocation2 + $0x210] ss:$8 sps:$4 sm:$0xff]   ;;  %v1811_v10 = vld [vmem:[#allocation2 + $0xd4] ss:$8 sps:$4 sm:$0xff]  }
  0x49   : > { %885 = vmatprep.subr.bf16.mxu1 %v1763_v34  ;;  %v1807_v7 = vld [vmem:[#allocation2 + $0xc0] ss:$8 sps:$4 sm:$0xff]   ;;  %v280_v8 = vld [vmem:[%s2073_s29 + $0x58] sm:$0xff]  ;;  %v1756_v9 = vld [vmem:[#allocation2 + $0x224] ss:$8 sps:$4 sm:$0xff]  }
  0x4a   : > { %931 = vmatpush1.bf16.msra.mxu0 %v1708_v15  ;;  %v286_v11 = vpack.c.bf16 %v280_v8, %v274_v5  ;;  %907 = vmatprep.mubr.bf16.mxu1 %v282_v4  ;;  %v1754_v12 = vld [vmem:[#allocation2 + $0x220] ss:$8 sps:$4 sm:$0xff]   ;;  %v1813_v13 = vld [vmem:[#allocation2 + $0xd0] ss:$8 sps:$4 sm:$0xff]   ;;  %v1762_v14 = vld [vmem:[#allocation2 + $0x234] ss:$8 sps:$4 sm:$0xff]  }
  0x4b   : > { %932 = vmatprep.subr.bf16.mxu0 %v1709_v16  ;;  %v1817_v15 = vld [vmem:[#allocation2 + $0xe4] ss:$8 sps:$4 sm:$0xff]   ;;  %v1760_v16 = vld [vmem:[#allocation2 + $0x230] ss:$8 sps:$4 sm:$0xff]   ;;  %v1819_v17 = vld [vmem:[#allocation2 + $0xe0] ss:$8 sps:$4 sm:$0xff]  }
  0x4c   : > { %886 = vmatpush1.bf16.msra.mxu1 %v1765_v37  ;;  %v1768_v18 = vld [vmem:[#allocation2 + $0x244] ss:$8 sps:$4 sm:$0xff]   ;;  %v1823_v19 = vld [vmem:[#allocation2 + $0xf4] ss:$8 sps:$4 sm:$0xff]   ;;  %v1825_v23 = vld [vmem:[#allocation2 + $0xf0] ss:$8 sps:$4 sm:$0xff]  }
  0x4d   : > { %887 = vmatprep.subr.bf16.mxu1 %v1769_v38  ;;  %v1025_v21 = vld [vmem:[%s2244_s3 + $0x88] sm:$0xff]  ;;  %v269_v24 = vld [vmem:[%s2073_s29] sm:$0xff]  ;;  %v1026_v30 = vld [vmem:[%s2244_s3 + $0x90] sm:$0xff] }
  0x4e   : > { %933 = vmatpush1.bf16.msra.mxu0 %v1711_v22  ;;  %v1766_v22 = vld [vmem:[#allocation2 + $0x240] ss:$8 sps:$4 sm:$0xff]   ;;  %v1542_v27 = vpack.c.bf16 %v1025_v21, %v1024_v20  ;;  %v1772_v33 = vld [vmem:[#allocation2 + $0x250] ss:$8 sps:$4 sm:$0xff]   ;;  %v1816_v57 = vld [vmem:[#allocation2 + $0x2c4] ss:$8 sps:$4 sm:$0xff]  }
  0x4f   : > { %934 = vmatprep.subr.bf16.mxu0 %v1712_v25  ;;  %v275_v25 = vld [vmem:[%s2073_s29 + $0x30] sm:$0xff]  ;;  %v1009_v29 = vld [vmem:[%s2244_s3 + $0x8] sm:$0xff]  ;;  %v1011_v38 = vld [vmem:[%s2244_s3 + $0x18] sm:$0xff] }
  0x50   : > { %888 = vmatpush1.bf16.msra.mxu1 %v1771_v41  ;;  %v1010_v37 = vld [vmem:[%s2244_s3 + $0x10] sm:$0xff]  ;;  %v1778_v41 = vld [vmem:[#allocation2 + $0x260] ss:$8 sps:$4 sm:$0xff]   ;;  %v1031_v5 = vld [vmem:[%s2244_s3 + $0xb8] sm:$0xff] }
  0x51   : > { %889 = vmatprep.subr.bf16.mxu1 %v1775_v42  ;;  %v1548_v42 = vpack.c.bf16 %v1011_v38, %v1010_v37  ;;  %v1814_v58 = vld [vmem:[#allocation2 + $0x2c0] ss:$8 sps:$4 sm:$0xff]   ;;  %v279_v2 = vld [vmem:[%s2073_s29 + $0x50] sm:$0xff]  ;;  %v1015_v8 = vld [vmem:[%s2244_s3 + $0x38] sm:$0xff]  ;;  %v385_v38 = vlaneseq }
  0x52   : > { %935 = vmatpush1.bf16.msra.mxu0 %v1714_v26  ;;  %v1774_v26 = vld [vmem:[#allocation2 + $0x254] ss:$8 sps:$4 sm:$0xff]  }
  0x53   : > { %936 = vmatprep.subr.bf16.mxu0 %v1715_v28  ;;  %v1008_v28 = vld [vmem:[%s2244_s3] sm:$0xff]  ;;  %v1030_v4 = vld [vmem:[%s2244_s3 + $0xb0] sm:$0xff]  ;;  %v1019_v20 = vld [vmem:[%s2244_s3 + $0x58] sm:$0xff] }
  0x54   : > { %890 = vmatpush1.bf16.msra.mxu1 %v1777_v45  ;;  %v1544_v34 = vpack.c.bf16 %v1009_v29, %v1008_v28  ;;  %v1012_v45 = vld [vmem:[%s2244_s3 + $0x20] sm:$0xff]  ;;  %v1039_v29 = vld [vmem:[%s2244_s3 + $0xf8] sm:$0xff] }
  0x55   : > { %891 = vmatprep.subr.bf16.mxu1 %v1781_v46  ;;  %v1013_v46 = vld [vmem:[%s2244_s3 + $0x28] sm:$0xff] }
  0x56   : > { %937 = vmatpush1.bf16.msra.mxu0 %v1717_v31  ;;  %v1027_v31 = vld [vmem:[%s2244_s3 + $0x98] sm:$0xff] }
  0x57   : > { %938 = vmatprep.subr.bf16.mxu0 %v1718_v32  ;;  %v281_v32 = vpack.c.bf16 %v275_v25, %v269_v24  ;;  %v1020_v25 = vld [vmem:[%s2244_s3 + $0x60] sm:$0xff] }
  0x58   : > { %892 = vmatpush1.bf16.msra.mxu1 %v1783_v49  ;;  %v1792_v49 = vld [vmem:[#allocation2 + $0x284] ss:$8 sps:$4 sm:$0xff]  }
  0x59   : > { %893 = vmatprep.subr.bf16.mxu1 %v1787_v50  ;;  %v1790_v50 = vld [vmem:[#allocation2 + $0x280] ss:$8 sps:$4 sm:$0xff]  }
  0x5a   : > { %939 = vmatpush1.bf16.msra.mxu0 %v1720_v35  ;;  %v1780_v35 = vld [vmem:[#allocation2 + $0x264] ss:$8 sps:$4 sm:$0xff]  }
  0x5b   : > { %940 = vmatprep.subr.bf16.mxu0 %v1721_v36  ;;  %v1546_v36 = vpack.c.bf16 %v1027_v31, %v1026_v30  ;;  %v1022_v30 = vld [vmem:[%s2244_s3 + $0x70] sm:$0xff]  ;;  %v1023_v31 = vld [vmem:[%s2244_s3 + $0x78] sm:$0xff] }
  0x5c   : > { %894 = vmatpush1.bf16.msra.mxu1 %v1789_v53  ;;  %v1804_v53 = vld [vmem:[#allocation2 + $0x2a4] ss:$8 sps:$4 sm:$0xff]  }
  0x5d   : > { %895 = vmatprep.subr.bf16.mxu1 %v1793_v54  ;;  %v1802_v54 = vld [vmem:[#allocation2 + $0x2a0] ss:$8 sps:$4 sm:$0xff]  }
  0x5e   : > { %941 = vmatpush1.bf16.msra.mxu0 %v1723_v39  ;;  %v1028_v39 = vld [vmem:[%s2244_s3 + $0xa0] sm:$0xff] }
  0x5f   : > { %942 = vmatprep.subr.bf16.mxu0 %v1724_v40  ;;  %v1029_v40 = vld [vmem:[%s2244_s3 + $0xa8] sm:$0xff] }
  0x60   : > { %896 = vmatpush1.bf16.msra.mxu1 %v1795_v59  ;;  %v1822_v59 = vld [vmem:[#allocation2 + $0x2d4] ss:$8 sps:$4 sm:$0xff]  }
  0x61   : > { %897 = vmatprep.subr.bf16.mxu1 %v1799_v60  ;;  %v1820_v60 = vld [vmem:[#allocation2 + $0x2d0] ss:$8 sps:$4 sm:$0xff]  }
  0x62   : > { %943 = vmatpush1.bf16.msra.mxu0 %v1726_v43  ;;  %v1786_v43 = vld [vmem:[#allocation2 + $0x274] ss:$8 sps:$4 sm:$0xff]  }
  0x63   : > { %944 = vmatprep.subr.bf16.mxu0 %v1727_v44  ;;  %v1550_v44 = vpack.c.bf16 %v1029_v40, %v1028_v39  ;;  %v386_v39 = vshrl.u32 %v385_v38, 7 }
  0x64   : > { %898 = vmatpush1.bf16.msra.mxu1 %v1801_v0  ;;  %v1829_v0 = vld [vmem:[#allocation2 + $0x2f0] ss:$8 sps:$4 sm:$0xff]  }
  0x65   : > { %899 = vmatprep.subr.bf16.mxu1 %v1805_v1  ;;  %v273_v1 = vld [vmem:[%s2073_s29 + $0x20] sm:$0xff]  ;;  %v387_v40 = vsub.s32 0, %v386_v39  ;;  %s244_s29 = sand.u32 1, %s1926_s18   ;;  %s1155_s18 = ssub.s32 (%p2255_p6), 3, %s2066_s20 }
  0x66   : > { %945 = vmatpush1.bf16.msra.mxu0 %v1729_v47  ;;  %v1784_v47 = vld [vmem:[#allocation2 + $0x270] ss:$8 sps:$4 sm:$0xff]   ;;  %v285_v3 = vpack.c.bf16 %v279_v2, %v273_v1  ;;  %s1384_s27 = sshll.u32 %s244_s29, 4  ;;  %p1156_p7 = scmp.lt.s32.totalorder (%p2255_p6), %s1155_s18, 2 }
  0x67   : > { %946 = vmatprep.subr.bf16.mxu0 %v1730_v48  ;;  %v1552_v48 = vpack.c.bf16 %v1013_v46, %v1012_v45  ;;  %s2194_s28 = scalar_lea.vmem [#allocation4], %s1384_s27  }
  0x68   : > { %900 = vmatpush1.bf16.msra.mxu1 %v1807_v7  ;;  %v1014_v7 = vld [vmem:[%s2244_s3 + $0x30] sm:$0xff] }
  0x69   : > { %901 = vmatprep.subr.bf16.mxu1 %v1811_v10  ;;  %v1032_v10 = vld [vmem:[%s2244_s3 + $0xc0] sm:$0xff] }
  0x6a   : > { %947 = vmatpush1.bf16.msra.mxu0 %v1732_v51  ;;  %v1798_v51 = vld [vmem:[#allocation2 + $0x294] ss:$8 sps:$4 sm:$0xff]  }
  0x6b   : > { %948 = vmatprep.subr.bf16.mxu0 %v1736_v52  ;;  %v1796_v52 = vld [vmem:[#allocation2 + $0x290] ss:$8 sps:$4 sm:$0xff]  }
  0x6c   : > { %902 = vmatpush1.bf16.msra.mxu1 %v1813_v13  ;;  %v1016_v13 = vld [vmem:[%s2244_s3 + $0x40] sm:$0xff] }
  0x6d   : > { %903 = vmatprep.subr.bf16.mxu1 %v1817_v15 }
  0x6e   : > { %949 = vmatpush1.bf16.msra.mxu0 %v1738_v55  ;;  %v1810_v55 = vld [vmem:[#allocation2 + $0x2b4] ss:$8 sps:$4 sm:$0xff]  }
  0x6f   : > { %961 = vmatprep.subr.bf16.mxu0 %v1744_v56  ;;  %v1808_v56 = vld [vmem:[#allocation2 + $0x2b0] ss:$8 sps:$4 sm:$0xff]  }
  0x70   : > { %904 = vmatpush1.bf16.msra.mxu1 %v1819_v17  ;;  %v1035_v17 = vld [vmem:[%s2244_s3 + $0xd8] sm:$0xff] }
  0x71   : > { %951 = vmatmul.mubr.bf16.vlgmr.msra.gmra.mrb[0].mxu0 %v283_v62  ;;  %905 = vmatprep.subr.bf16.mxu1 %v1823_v19  ;;  %v1826_v62 = vld [vmem:[#allocation2 + $0x2e0] ss:$8 sps:$4 sm:$0xff]   ;;  %v1018_v19 = vld [vmem:[%s2244_s3 + $0x50] sm:$0xff] }
  0x72   : > { %962 = vmatpush1.bf16.msra.mxu0 %v1742_v61  ;;  %993 = vmatprep.mubr.bf16.mxu0 %v286_v11  ;;  %v1828_v61 = vld [vmem:[#allocation2 + $0x2e4] ss:$8 sps:$4 sm:$0xff]   ;;  %v1564_v21 = vpack.c.bf16 %v1019_v20, %v1018_v19 }
  0x73   : > { %963 = vmatprep.subr.bf16.mxu0 %v1750_v63  ;;  %v1831_v63 = vld [vmem:[#allocation2 + $0x2f4] ss:$8 sps:$4 sm:$0xff]   ;;  %v1033_v11 = vld [vmem:[%s2244_s3 + $0xc8] sm:$0xff] }
  0x74   : > { %906 = vmatpush1.bf16.msra.mxu1 %v1825_v23  ;;  %v1037_v23 = vld [vmem:[%s2244_s3 + $0xe8] sm:$0xff] }
  0x75   : > { %1543 = vmatprep.subr.bf16.mxu1 %v1542_v27  ;;  %v1038_v27 = vld [vmem:[%s2244_s3 + $0xf0] sm:$0xff] }
  0x76   : > { %964 = vmatpush1.bf16.msra.mxu0 %v1748_v6  ;;  %v1554_v6 = vpack.c.bf16 %v1031_v5, %v1030_v4 }
  0x77   : > { %965 = vmatprep.subr.bf16.mxu0 %v1756_v9  ;;  %908 = vmatmul.mubr.bf16.vlgmr.msra.gmra.mrb[0].mxu1 %v281_v32  ;;  %v1556_v9 = vpack.c.bf16 %v1015_v8, %v1014_v7  ;;  %v1570_v32 = vpack.c.bf16 %v1039_v29, %v1038_v27 }
  0x78   : > { %1545 = vmatpush3.bf16.msra.mxu1 %v1544_v34 }
  0x79   : > { %1547 = vmatprep.subr.bf16.mxu1 %v1546_v36 }
  0x7a   : > { %966 = vmatpush1.bf16.msra.mxu0 %v1754_v12  ;;  %v1558_v12 = vpack.c.bf16 %v1033_v11, %v1032_v10 }
  0x7b   : > { %967 = vmatprep.subr.bf16.mxu0 %v1762_v14  ;;  %v1017_v14 = vld [vmem:[%s2244_s3 + $0x48] sm:$0xff] }
  0x7c   : > { %1549 = vmatpush3.bf16.msra.mxu1 %v1548_v42  ;;  %v1560_v15 = vpack.c.bf16 %v1017_v14, %v1016_v13  ;;  %v391_v42 = vsub.s32 1, %v386_v39 }
  0x7d   : > { %1551 = vmatprep.subr.bf16.mxu1 %v1550_v44 }
  0x7e   : > { %968 = vmatpush1.bf16.msra.mxu0 %v1760_v16  ;;  %v1034_v16 = vld [vmem:[%s2244_s3 + $0xd0] sm:$0xff] }
  0x7f   : > { %969 = vmatprep.subr.bf16.mxu0 %v1768_v18  ;;  %v1562_v18 = vpack.c.bf16 %v1035_v17, %v1034_v16 }
  0x80   : > { %1553 = vmatpush3.bf16.msra.mxu1 %v1552_v48 }
  0x81   : > { %1555 = vmatprep.subr.bf16.mxu1 %v1554_v6 }
  0x82   : > { %970 = vmatpush1.bf16.msra.mxu0 %v1766_v22  ;;  %v1036_v22 = vld [vmem:[%s2244_s3 + $0xe0] sm:$0xff] }
  0x83   : > { %971 = vmatprep.subr.bf16.mxu0 %v1774_v26  ;;  %v1566_v24 = vpack.c.bf16 %v1037_v23, %v1036_v22  ;;  %v1021_v26 = vld [vmem:[%s2244_s3 + $0x68] sm:$0xff] }
  0x84   : > { %1557 = vmatpush3.bf16.msra.mxu1 %v1556_v9  ;;  %v1568_v28 = vpack.c.bf16 %v1021_v26, %v1020_v25 }
  0x85   : > { %1559 = vmatprep.subr.bf16.mxu1 %v1558_v12 }
  0x86   : > { %972 = vmatpush1.bf16.msra.mxu0 %v1772_v33  ;;  %v1572_v33 = vpack.c.bf16 %v1023_v31, %v1022_v30 }
  0x87   : > { %973 = vmatprep.subr.bf16.mxu0 %v1780_v35 }
  0x88   : > { %1561 = vmatpush3.bf16.msra.mxu1 %v1560_v15 }
  0x89   : > { %1563 = vmatprep.subr.bf16.mxu1 %v1562_v18 }
  0x8a   : > { %974 = vmatpush1.bf16.msra.mxu0 %v1778_v41  ;;  %v383_v41 = vld [vmem:[%s2243_s2] sm:$0x3] }
  0x8b   : > { %975 = vmatprep.subr.bf16.mxu0 %v1786_v43  ;;  %v388_v43 = vrot.slane %v383_v41, %v387_v40  ;;  %v392_v44 = vrot.slane %v383_v41, %v391_v42 }
  0x8c   : > { %1565 = vmatpush3.bf16.msra.mxu1 %v1564_v21 }
  0x8d   : > { %1567 = vmatprep.subr.bf16.mxu1 %v1566_v24 }
  0x8e   : > { %976 = vmatpush1.bf16.msra.mxu0 %v1784_v47 }
  0x8f   : > { %977 = vmatprep.subr.bf16.mxu0 %v1792_v49 }
  0x90   : > { %1569 = vmatpush3.bf16.msra.mxu1 %v1568_v28 }
  0x91   : > { %1571 = vmatprep.subr.bf16.mxu1 %v1570_v32 }
  0x92   : > { %978 = vmatpush1.bf16.msra.mxu0 %v1790_v50 }
  0x93   : > { %979 = vmatprep.subr.bf16.mxu0 %v1798_v51 }
  0x94   : > { %1573 = vmatpush3.bf16.msra.mxu1 %v1572_v33 }
  0x96   : > { %980 = vmatpush1.bf16.msra.mxu0 %v1796_v52 }
  0x97   : > { %981 = vmatprep.subr.bf16.mxu0 %v1804_v53 }
  0x9a   : > { %982 = vmatpush1.bf16.msra.mxu0 %v1802_v54 }
  0x9b   : > { %983 = vmatprep.subr.bf16.mxu0 %v1810_v55 }
  0x9e   : > { %984 = vmatpush1.bf16.msra.mxu0 %v1808_v56 }
  0x9f   : > { %985 = vmatprep.subr.bf16.mxu0 %v1816_v57 }
  0xa2   : > { %986 = vmatpush1.bf16.msra.mxu0 %v1814_v58 }
  0xa3   : > { %987 = vmatprep.subr.bf16.mxu0 %v1822_v59 }
  0xa6   : > { %988 = vmatpush1.bf16.msra.mxu0 %v1820_v60 }
  0xa7   : > { %989 = vmatprep.subr.bf16.mxu0 %v1828_v61 }
  0xaa   : > { %990 = vmatpush1.bf16.msra.mxu0 %v1826_v62 }
  0xab   : > { %991 = vmatprep.subr.bf16.mxu0 %v1831_v63  ;;  %v1483_v63 = vld [vmem:[%s2245_s4] ss:$0 sm:$0xff] }
  0xae   : > { %992 = vmatpush1.bf16.msra.mxu0 %v1829_v0 }
  0xb1   : > { %994 = vmatmul.mubr.bf16.vlgmr.msra.gmra.mrb[0].mxu0 %v285_v3 }
 0x14a   : > { %v909_v34 = vpop.f32.mrb[0].mxu1 }
 0x14b   : > { %v911_v35 = vpop.f32.mrb[1].mxu1  ;;  %v910_v45 = vadd.f32 %v909_v34, %v388_v43 }
 0x14c   : > { %v913_v36 = vpop.f32.mrb[2].mxu1  ;;  %v912_v46 = vadd.f32 %v911_v35, %v392_v44 }
 0x14d   : > { %v915_v37 = vpop.f32.mrb[3].mxu1  ;;  %v914_v48 = vadd.f32 %v913_v36, %v388_v43 }
 0x14e   : > { %v916_v51 = vadd.f32 %v915_v37, %v392_v44 }
 0x184   : > { %v995_v47 = vpop.f32.mrb[0].mxu0 }
 0x185   : > { %v1575_v49 = vadd.f32 %v995_v47, %v910_v45  ;;  %v997_v50 = vpop.f32.mrb[1].mxu0 }
 0x186   : > { %v1577_v52 = vadd.f32 %v997_v50, %v912_v46  ;;  %v999_v53 = vpop.f32.mrb[2].mxu0 }
 0x187   : > { %v1579_v54 = vadd.f32 %v999_v53, %v914_v48  ;;  %v1001_v55 = vpop.f32.mrb[3].mxu0 }
 0x188   : > { %1832 = vtanh.f32 %v1577_v52  ;;  %v1581_v56 = vadd.f32 %v1001_v55, %v916_v51 }
 0x189   : > { %1834 = vtanh.f32 %v1575_v49 }
 0x18a   : > { %1836 = vtanh.f32 %v1581_v56 }
 0x18b   : > { %1838 = vtanh.f32 %v1579_v54 }
 0x192   : > { %v1833_v57 = vpop.eup %1832 }
 0x193   : > { %v1835_v58 = vpop.eup %1834  ;;  %1111 = vmatprep.mubr.f32.mxu1 %v1833_v57 }
 0x194   : > { %v1837_v59 = vpop.eup %1836  ;;  %1112 = vmatmul.mubr.f32.vlgmr.msra.gmra.mrb[4].mxu1 %v1835_v58 }
 0x195   : > { %1116 = vmatprep.mubr.f32.mxu1 %v1837_v59  ;;  %v1839_v60 = vpop.eup %1838 }
 0x198   : > { %1117 = vmatmul.mubr.f32.gmra.mrb[6].mxu1 %v1839_v60 }
 0x267   : > { %v1536_v61 = vpop.f32.mrb[4].mxu1 }
 0x268   : > { %v1537_v62 = vpop.f32.mrb[5].mxu1 }
 0x269   : > { %v1538_v0 = vadd.f32 %v1537_v62, %v1536_v61 }
 0x26b   : > { %v1539_v1 = vpop.f32.mrb[6].mxu1  ;;  %v1114_v2 = vadd.f32 %v1538_v0, %v1483_v63 }
 0x26c   : > { %v1540_v3 = vpop.f32.mrb[7].mxu1 }
 0x26d   : > { %v1541_v4 = vadd.f32 %v1540_v3, %v1539_v1  ;;  %v1123_v5 = vsel %vm1122_vm0, %v1114_v2, -inf }
 0x26e   : > { %1124 = vmax.xlane.f32.xlu0 %v1123_v5 }
 0x26f   : > { %v1119_v6 = vadd.f32 %v1541_v4, %v1483_v63 }
 0x271   : > { %v1126_v7 = vsel %vm1122_vm0, %v1119_v6, -inf }
 0x272   : > { %1127 = vmax.xlane.f32.xlu0 %v1126_v7 }
 0x2fb   : > { %v1125_v8 = vpop.xlane.xlu0 %1124 }
 0x2fc   : > { %v1129_v9 = vsub.f32 %v1114_v2, %v1125_v8 }
 0x2fe   : > { %v1131_v10 = vmul.f32 1.442695, %v1129_v9 }
 0x2ff   : > { %v1128_v11 = vpop.xlane.xlu0 %1127 }
 0x300   : > { %1840 = vpow2.f32 %v1131_v10  ;;  %v1130_v12 = vsub.f32 %v1119_v6, %v1128_v11 }
 0x302   : > { %v1133_v13 = vmul.f32 1.442695, %v1130_v12 }
 0x304   : > { %1842 = vpow2.f32 %v1133_v13 }
 0x30a   : > { %v1841_v14 = vpop.eup %1840 }
 0x30b   : > { %v1135_v15 = vsel %vm1122_vm0, %v1841_v14, 0.0 }
 0x30c   : > { %1136 = vadd.xlane.f32.xlu1 %v1135_v15 }
 0x30e   : > { %v1843_v16 = vpop.eup %1842 }
 0x30f   : > { %v1138_v17 = vsel %vm1122_vm0, %v1843_v16, 0.0 }
 0x310   : > { %1139 = vadd.xlane.f32.xlu1 %v1138_v17 }
 0x399   : > { %v1137_v18 = vpop.xlane.xlu1 %1136 }
 0x39a   : > { %1844 = vrcp.f32 %v1137_v18 }
 0x39d   : > { %v1140_v19 = vpop.xlane.xlu1 %1139 }
 0x39e   : > { %1846 = vrcp.f32 %v1140_v19 }
 0x3a4   : > { %v1845_v20 = vpop.eup %1844 }
 0x3a5   : > { %v1142_v21 = vmul.f32 %v1845_v20, %v1841_v14  ;;  %1153 = sbr.rel (!%p2255_p6) target bundleno = 989 (0x3dd), region = 48 }
 0x3a7   : > { %1145 = vst.msk [vmem:[%s2194_s28] sm:$0xff] %vm1122_vm0, %v1142_v21 }
 0x3a8   : > { %v1847_v22 = vpop.eup %1846 }
 0x3a9   : > { %v1144_v23 = vmul.f32 %v1847_v22, %v1843_v16 }
 0x3ab   : > { %1146 = vst.msk [vmem:[%s2194_s28 + $0x8] sm:$0xff] %vm1122_vm0, %v1144_v23 }
 0x3ac   : > { %s2260_s18 = smov (!%p1156_p7, %s1155_s18), 2 }
 0x3ad   : > { %s1486_s9 = sshll.u32 %s2260_s18, 7 }
 0x3ae   : > { %p1489_p9 = scmp.eq.s32.totalorder %s1486_s9, 0 }
 0x3af   : > { %s2213_s10 = sshrl.u32 (!%p1489_p9), %s2260_s18, 1 }
 0x3b0   : > { %1164 = sbr.rel (%p1489_p9) target bundleno = 989 (0x3dd), region = 52  ;;  %p1490_p13 = scmp.le.s32.totalorder (!%p1489_p9), %s2213_s10, 0 }
 0x3b7   : > { %1325 = sbr.rel (%p1490_p13) target bundleno = 968 (0x3c8), region = 129  ;;  %s1936_s21 = smov (!%p1490_p13), %s2207_s8  }
 0x3b8   : > { %s1940_s26 = smov (!%p1490_p13), %s2194_s28   ;;  %s1944_s20 = smov (!%p1490_p13), 0  }
 0x3b9   : > { %s1948_s11 = smov (!%p1490_p13), 0  }
 0x3be LB: >> { %v1228_v24 = vld [vmem:[%s1942_s26] sm:$0xff]  ;;  %v1230_v25 = vld [vmem:[%s1942_s26 + $0x8] sm:$0xff]  ;;  %s1232_s12 = sadd.s32 1, %s1946_s20  ;;  %s1222_s11 = sadd.s32 1, %s1950_s11   ;;  %s1950_s11 = sphi %s1948_s11, %s1222_s11   ;;  %s1946_s20 = sphi %s1944_s20, %s1945_s20   ;;  %s1942_s26 = sphi %s1940_s26, %s1237_s26   ;;  %s1938_s21 = sphi %s1936_s21, %s1238_s21  }
 0x3bf   : >> { %1229 = vst [vmem:[%s1938_s21] sm:$0xff] %v1228_v24  ;;  %1231 = vst [vmem:[%s1938_s21 + $0x8] sm:$0xff] %v1230_v25  ;;  %p1233_p0 = scmp.ge.s32.totalorder %s1232_s12, %s2213_s10  ;;  %p1221_p1 = scmp.ge.s32.totalorder %s1222_s11, %s2213_s10 }
 0x3c1   : >> { %s2262_s12 = smov (%p1233_p0, %s1232_s12), 0  ;;  %1224 = sbr.rel (!%p1221_p1) target bundleno = 958 (0x3be), region = 135 }
 0x3c2   : >> { %s1491_s13 = sshll.u32 %s2262_s12, 4  ;;  %s1945_s20 = smov %s2262_s12  }
 0x3c3   : >> { %s1237_s26 = scalar_lea.vmem %s2194_s28, %s1491_s13 [#allocation4]   ;;  %s1238_s21 = scalar_lea.vmem %s2207_s8, %s1491_s13  }
 0x3c8 PF: > { %s2223_s14 = sand.u32 1, %s2260_s18   ;;  %s1502_s15 = sshll.u32 %s2213_s10, 4 }
 0x3c9   : > { %s1243_s16 = scalar_lea.vmem %s2194_s28, %s1502_s15 [#allocation4]   ;;  %s1245_s17 = scalar_lea.vmem %s2207_s8, %s1502_s15  }
 0x3ca   : > { %p1496_p2 = scmp.le.s32.totalorder %s2223_s14, 0 }
 0x3cb   : > { %s1952_s23 = smov (!%p1496_p2), %s1245_s17   ;;  %s1956_s24 = smov (!%p1496_p2), %s1243_s16  }
 0x3cc   : > { %1339 = sbr.rel (%p1496_p2) target bundleno = 989 (0x3dd), region = 140  ;;  %s1960_s29 = smov (!%p1496_p2), 0  }
 0x3cd   : > { %s1964_s27 = smov (!%p1496_p2), 0  }
 0x3d3 LB: >> { %v1255_v26 = vld [vmem:[%s1958_s24] sm:$0xff]  ;;  %s1257_s18 = sadd.s32 1, %s1962_s29  ;;  %s1249_s27 = sadd.s32 1, %s1966_s27   ;;  %s1966_s27 = sphi %s1964_s27, %s1249_s27   ;;  %s1962_s29 = sphi %s1960_s29, %s1961_s29   ;;  %s1958_s24 = sphi %s1956_s24, %s1262_s24   ;;  %s1954_s23 = sphi %s1952_s23, %s1263_s23  }
 0x3d4   : >> { %1256 = vst [vmem:[%s1954_s23] sm:$0xff] %v1255_v26  ;;  %p1258_p3 = scmp.ge.s32.totalorder %s1257_s18, %s2223_s14  ;;  %p1248_p5 = scmp.ge.s32.totalorder %s1249_s27, %s2223_s14 }
 0x3d6   : >> { %s2264_s18 = smov (%p1258_p3, %s1257_s18), 0  ;;  %1251 = sbr.rel (!%p1248_p5) target bundleno = 979 (0x3d3), region = 146 }
 0x3d7   : >> { %s1497_s28 = sshll.u32 %s2264_s18, 3  ;;  %s1961_s29 = smov %s2264_s18  }
 0x3d8   : >> { %s1262_s24 = scalar_lea.vmem %s1243_s16, %s1497_s28 [#allocation4]   ;;  %s1263_s23 = scalar_lea.vmem %s1245_s17, %s1497_s28  }
 0x3dd PF: > { %p13_p8 = scmp.ge.s32.totalorder %s2016_s22, 4   ;;  %s2256_s18 = smov %s1930_s19 }
 0x3de   : > { %s2257_s19 = smov %s2024_s25  ;;  %s2258_s20 = smov %s2016_s22 }
 0x3df   :  { %15 = sbr.rel (!%p13_p8) target bundleno = 2 (0x2), region = 157 }
 0x3e6   :  { %1279 = vsyncpa [#allocation3], 1 }
 0x3e7   :  { %1281 = vsyncpa [#allocation3 + $0x1], 1 }

</bundles_post_ra>
